<compile_context>
chip_gen: v6e
topology: v6e:2x2x1
jax: 0.10.0
libtpu: 0.0.40
codegen_flags: <defaults>
</compile_context>

<pallas_src>
import functools

import jax
import jax.numpy as jnp
from jax.experimental import pallas as pl
from jax.experimental.pallas import tpu as pltpu


# ----------------------------- Pallas kernel -------------------------------

def _tri_conv1x1_kernel(v_ref, w_ref, x_ref, wv_ref, ww_ref, wx_ref,
                        ov_ref, ow_ref, ox_ref):
    # inputs : v/w/x_ref  -> (NB, Cin, COLS) pixel slabs (lane axis = pixels)
    #          wv/ww/wx   -> (Cout, Cin) weights (resident, tiny)
    # outputs: ov/ow/ox   -> (NB, Cout, COLS) lane-dense stores
    nb = v_ref.shape[0]
    for b in range(nb):                     # static unroll, nb <= 8
        ov_ref[b] = jnp.dot(wv_ref[...], v_ref[b],
                            preferred_element_type=jnp.float32).astype(ov_ref.dtype)
        ow_ref[b] = jnp.dot(ww_ref[...], w_ref[b],
                            preferred_element_type=jnp.float32).astype(ow_ref.dtype)
        ox_ref[b] = jnp.dot(wx_ref[...], x_ref[b],
                            preferred_element_type=jnp.float32).astype(ox_ref.dtype)


# ----------------------------- tile planning --------------------------------

_MAX_BATCH_BLOCK = 8        # static-unroll bound inside the kernel
_MIN_TILE_COLS = 2048       # target lane columns / step (>= 8 KiB DMA rows)
_MAX_TILE_COLS = 8192       # ~86% of HBM roofline reached well before this


def _round_up(x, m):
    return -(-x // m) * m


@functools.lru_cache(maxsize=None)
def _vmem_capacity_bytes():
    """Per-core VMEM capacity, generation aware (64 MiB v7x, 128 MiB v5e/v6e)."""
    try:
        cap = getattr(pltpu.get_tpu_info(), "vmem_capacity_bytes", None)
        if cap:
            return int(cap)
    except Exception:
        pass
    return 64 << 20         # conservative default = v7x per-TC VMEM


def _largest_divisor_leq(n, cap):
    cap = max(1, min(n, cap))
    for d in range(cap, 0, -1):
        if n % d == 0:
            return d
    return 1


def _working_set_bytes(nb, thw, in_bufs, out_bufs, cin, cout, dt_bytes):
    """Padded VMEM footprint of one pipelined step (all buffers, 3 branches).

    Inputs pad Cin to a sublane multiple, outputs pad Cout likewise (the review
    noted the (4, thw) output blocks occupy 8 f32 sublanes), columns pad to 128
    lanes, and weight tiles are counted explicitly.
    """
    sub = 8 * max(1, 4 // dt_bytes)          # 8 for f32, 16 for bf16
    cin_p, cout_p = _round_up(cin, sub), _round_up(cout, sub)
    cols = _round_up(thw, 128)
    data = 3 * cols * dt_bytes * (in_bufs * nb * cin_p + out_bufs * nb * cout_p)
    weights = 2 * 3 * _round_up(cout, sub) * _round_up(cin, 128) * dt_bytes
    return data + weights


def _plan_blocks(n, cin, cout, hw, dt_bytes):
    """Pick (nb, thw, in_bufs, vmem_limit_bytes) for this device generation."""
    vmem_cap = _vmem_capacity_bytes()
    budget = min(vmem_cap // 2, 48 << 20)    # 32 MiB on v7x, 48 MiB on v5e/v6e

    def ws(nb_, thw_, in_bufs_=2):
        return _working_set_bytes(nb_, thw_, in_bufs_, 2, cin, cout, dt_bytes)

    if ws(1, hw) <= budget:
        # Whole H*W slab per image fits: batch-block small images so each grid
        # step moves a large contiguous slab instead of a few KiB.
        thw = hw
        nb = 1
        for cand in range(min(n, _MAX_BATCH_BLOCK), 0, -1):
            if n % cand == 0 and ws(cand, hw) <= budget:
                nb = cand
                break
    else:
        # Tile the pixel axis: largest lane-aligned tile in [2048, 8192]
        # columns that the VMEM budget allows.
        nb = 1
        sub = 8 * max(1, 4 // dt_bytes)
        cin_p, cout_p = _round_up(cin, sub), _round_up(cout, sub)
        per_col = 3 * dt_bytes * 2 * (cin_p + cout_p)      # double-buffered
        cols_cap = max(128, (budget // per_col // 128) * 128)
        thw = max(128, min(cols_cap, _MAX_TILE_COLS))

    # v7x has two TensorCores: guarantee >= 2 grid steps whenever the problem
    # offers any parallelism (prefer splitting batch to keep lanes dense).
    if pl.cdiv(n, nb) * pl.cdiv(hw, thw) < 2:
        if n >= 2:
            nb = _largest_divisor_leq(n, n // 2)
        elif hw >= 256:
            thw = max(128, (hw // 2 // 128) * 128)

    steps = pl.cdiv(n, nb) * pl.cdiv(hw, thw)
    # Fallback from the review: if tiles must stay small, deepen the input
    # pipeline to hide DMA latency (guarded; only when it can actually help).
    in_bufs = 3 if (thw < _MIN_TILE_COLS and steps >= 3) else 2

    working = _working_set_bytes(nb, thw, in_bufs, 2, cin, cout, dt_bytes)
    vmem_limit = int(max(32 << 20,
                         min(vmem_cap - (8 << 20), 2 * working + (4 << 20))))
    return nb, thw, in_bufs, vmem_limit


def _maybe_buffered_spec(block_shape, index_map, n_buffers):
    if n_buffers > 2:
        try:
            return pl.BlockSpec(block_shape, index_map,
                                pipeline_mode=pl.Buffered(n_buffers))
        except Exception:           # API variant without pipeline_mode
            pass
    return pl.BlockSpec(block_shape, index_map)


# ------------------------------- wrapper ------------------------------------

@jax.jit
def tri_conv1x1_nchw(v, w, x, wv, ww, wx):
    """Three fused bias-free 1x1 convs, NCHW in / NCHW out.

    v, w, x    : [N, Cin, H, W]
    wv, ww, wx : [Cout, Cin]   (PyTorch Conv2d weight with trailing 1x1 squeezed)
    """
    n, cin, h, wd = v.shape
    cout = wv.shape[0]
    hw = h * wd
    dtype = v.dtype
    dt_bytes = jnp.dtype(dtype).itemsize

    nb, thw, in_bufs, vmem_limit = _plan_blocks(n, cin, cout, hw, dt_bytes)
    grid = (pl.cdiv(n, nb), pl.cdiv(hw, thw))

    # NCHW -> [N, Cin, H*W] is a free contiguous reshape, no transpose.
    vf = v.reshape(n, cin, hw)
    wf = w.reshape(n, cin, hw)
    xf = x.reshape(n, cin, hw)

    in_spec = _maybe_buffered_spec((nb, cin, thw), lambda i, j: (i, 0, j), in_bufs)
    wt_spec = pl.BlockSpec((cout, cin), lambda i, j: (0, 0))
    out_spec = pl.BlockSpec((nb, cout, thw), lambda i, j: (i, 0, j))
    out_sds = jax.ShapeDtypeStruct((n, cout, hw), dtype)

    ov, ow, ox = pl.pallas_call(
        _tri_conv1x1_kernel,
        out_shape=(out_sds, out_sds, out_sds),
        grid=grid,
        in_specs=[in_spec, in_spec, in_spec, wt_spec, wt_spec, wt_spec],
        out_specs=(out_spec, out_spec, out_spec),
        compiler_params=pltpu.CompilerParams(
            dimension_semantics=("parallel", "parallel"),
            vmem_limit_bytes=vmem_limit,
        ),
    )(vf, wf, xf, wv, ww, wx)

    return (ov.reshape(n, cout, h, wd),
            ow.reshape(n, cout, h, wd),
            ox.reshape(n, cout, h, wd))


# ----------------------------- module wrapper --------------------------------

class TriFeatUpPallas:
    """JAX/Pallas equivalent of DExNet's three-branch feature-update:
    three independent Conv2d(2*chals, chals, 1, bias=False) applied to v, w, x.
    """

    def __init__(self, n_channels, chals, key):
        del n_channels  # unused by the PyTorch module's forward as well
        cin, cout = 2 * chals, chals
        kv, kw, kx = jax.random.split(key, 3)
        bound = 1.0 / jnp.sqrt(cin)
        self.wv = jax.random.uniform(kv, (cout, cin), jnp.float32, -bound, bound)
        self.ww = jax.random.uniform(kw, (cout, cin), jnp.float32, -bound, bound)
        self.wx = jax.random.uniform(kx, (cout, cin), jnp.float32, -bound, bound)

    def __call__(self, v, w, x):
        return tri_conv1x1_nchw(v, w, x, self.wv, self.ww, self.wx)


# --------------------------------- main --------------------------------------

if __name__ == "__main__":
    key = jax.random.PRNGKey(0)
    k_mod, k_v, k_w, k_x = jax.random.split(key, 4)

    batch, chals, spatial = 2, 4, 16
    cin = 2 * chals  # inputs carry 2*chals channels (NCHW)

    v = jax.random.normal(k_v, (batch, cin, spatial, spatial), jnp.float32)
    w = jax.random.normal(k_w, (batch, cin, spatial, spatial), jnp.float32)
    x = jax.random.normal(k_x, (batch, cin, spatial, spatial), jnp.float32)

    module = TriFeatUpPallas(n_channels=cin, chals=chals, key=k_mod)
    ov, ow, ox = module(v, w, x)
    jax.block_until_ready((ov, ow, ox))

    # Sanity check against a plain-JAX reference (einsum over channel dim).
    def ref(inp, wt):
        return jnp.einsum("nchw,oc->nohw", inp, wt)

    assert ov.shape == (batch, chals, spatial, spatial)
    assert ow.shape == (batch, chals, spatial, spatial)
    assert ox.shape == (batch, chals, spatial, spatial)
    assert jnp.allclose(ov, ref(v, module.wv), atol=1e-5)
    assert jnp.allclose(ow, ref(w, module.ww), atol=1e-5)
    assert jnp.allclose(ox, ref(x, module.wx), atol=1e-5)

    print("KERNEL_OK")
</pallas_src>

<mosaic_0001>
module attributes {stable_mosaic.version = 11 : i64} {
  func.func @_tri_conv1x1_kernel(%arg0: i32, %arg1: i32, %arg2: memref<1x8x256xf32, #tpu.memory_space<vmem>>, %arg3: memref<1x8x256xf32, #tpu.memory_space<vmem>>, %arg4: memref<1x8x256xf32, #tpu.memory_space<vmem>>, %arg5: memref<4x8xf32, #tpu.memory_space<vmem>>, %arg6: memref<4x8xf32, #tpu.memory_space<vmem>>, %arg7: memref<4x8xf32, #tpu.memory_space<vmem>>, %arg8: memref<1x4x256xf32, #tpu.memory_space<vmem>>, %arg9: memref<1x4x256xf32, #tpu.memory_space<vmem>>, %arg10: memref<1x4x256xf32, #tpu.memory_space<vmem>>) attributes {dimension_semantics = [#tpu.dimension_semantics<parallel>, #tpu.dimension_semantics<parallel>], iteration_bounds = array<i64: 2, 1>, scalar_prefetch = 0 : i64, scratch_operands = 0 : i64, tpu.core_type = #tpu.core_type<tc>, window_params = [{transform_indices = @transform_0, window_bounds = array<i64: 1, 8, 256>}, {transform_indices = @transform_1, window_bounds = array<i64: 1, 8, 256>}, {transform_indices = @transform_2, window_bounds = array<i64: 1, 8, 256>}, {pipeline_mode = #tpu.pipeline_mode<synchronous>, transform_indices = @transform_3, window_bounds = array<i64: 4, 8>}, {pipeline_mode = #tpu.pipeline_mode<synchronous>, transform_indices = @transform_4, window_bounds = array<i64: 4, 8>}, {pipeline_mode = #tpu.pipeline_mode<synchronous>, transform_indices = @transform_5, window_bounds = array<i64: 4, 8>}, {transform_indices = @transform_6, window_bounds = array<i64: 1, 4, 256>}, {transform_indices = @transform_7, window_bounds = array<i64: 1, 4, 256>}, {transform_indices = @transform_8, window_bounds = array<i64: 1, 4, 256>}]} {
    %c0 = arith.constant 0 : index
    %c0_0 = arith.constant 0 : index
    %0 = vector.load %arg5[%c0, %c0_0] : memref<4x8xf32, #tpu.memory_space<vmem>>, vector<4x8xf32>
    %c0_1 = arith.constant 0 : index
    %c0_2 = arith.constant 0 : index
    %c0_3 = arith.constant 0 : index
    %1 = vector.load %arg2[%c0_1, %c0_2, %c0_3] : memref<1x8x256xf32, #tpu.memory_space<vmem>>, vector<1x8x256xf32>
    %2 = vector.shape_cast %1 : vector<1x8x256xf32> to vector<8x256xf32>
    %cst = arith.constant dense<0.000000e+00> : vector<4x256xf32>
    %3 = tpu.matmul %0, %2, %cst {dimension_numbers = #tpu.dot_dimension_numbers<[1], [0], [0], [1], [0, 0, 1, 1], [], []>} : vector<4x8xf32>, vector<8x256xf32>, vector<4x256xf32> -> vector<4x256xf32>
    %c0_4 = arith.constant 0 : index
    %c0_5 = arith.constant 0 : index
    %c0_6 = arith.constant 0 : index
    %4 = vector.load %arg8[%c0_4, %c0_5, %c0_6] : memref<1x4x256xf32, #tpu.memory_space<vmem>>, vector<1x4x256xf32>
    %5 = vector.shape_cast %4 : vector<1x4x256xf32> to vector<4x256xf32>
    %6 = vector.shape_cast %3 : vector<4x256xf32> to vector<1x4x256xf32>
    tpu.vector_store %arg8[%c0_4, %c0_5, %c0_6], %6 {strides = array<i32>} : memref<1x4x256xf32, #tpu.memory_space<vmem>>, vector<1x4x256xf32>,
    %c0_7 = arith.constant 0 : index
    %c0_8 = arith.constant 0 : index
    %7 = vector.load %arg6[%c0_7, %c0_8] : memref<4x8xf32, #tpu.memory_space<vmem>>, vector<4x8xf32>
    %c0_9 = arith.constant 0 : index
    %c0_10 = arith.constant 0 : index
    %c0_11 = arith.constant 0 : index
    %8 = vector.load %arg3[%c0_9, %c0_10, %c0_11] : memref<1x8x256xf32, #tpu.memory_space<vmem>>, vector<1x8x256xf32>
    %9 = vector.shape_cast %8 : vector<1x8x256xf32> to vector<8x256xf32>
    %cst_12 = arith.constant dense<0.000000e+00> : vector<4x256xf32>
    %10 = tpu.matmul %7, %9, %cst_12 {dimension_numbers = #tpu.dot_dimension_numbers<[1], [0], [0], [1], [0, 0, 1, 1], [], []>} : vector<4x8xf32>, vector<8x256xf32>, vector<4x256xf32> -> vector<4x256xf32>
    %c0_13 = arith.constant 0 : index
    %c0_14 = arith.constant 0 : index
    %c0_15 = arith.constant 0 : index
    %11 = vector.load %arg9[%c0_13, %c0_14, %c0_15] : memref<1x4x256xf32, #tpu.memory_space<vmem>>, vector<1x4x256xf32>
    %12 = vector.shape_cast %11 : vector<1x4x256xf32> to vector<4x256xf32>
    %13 = vector.shape_cast %10 : vector<4x256xf32> to vector<1x4x256xf32>
    tpu.vector_store %arg9[%c0_13, %c0_14, %c0_15], %13 {strides = array<i32>} : memref<1x4x256xf32, #tpu.memory_space<vmem>>, vector<1x4x256xf32>,
    %c0_16 = arith.constant 0 : index
    %c0_17 = arith.constant 0 : index
    %14 = vector.load %arg7[%c0_16, %c0_17] : memref<4x8xf32, #tpu.memory_space<vmem>>, vector<4x8xf32>
    %c0_18 = arith.constant 0 : index
    %c0_19 = arith.constant 0 : index
    %c0_20 = arith.constant 0 : index
    %15 = vector.load %arg4[%c0_18, %c0_19, %c0_20] : memref<1x8x256xf32, #tpu.memory_space<vmem>>, vector<1x8x256xf32>
    %16 = vector.shape_cast %15 : vector<1x8x256xf32> to vector<8x256xf32>
    %cst_21 = arith.constant dense<0.000000e+00> : vector<4x256xf32>
    %17 = tpu.matmul %14, %16, %cst_21 {dimension_numbers = #tpu.dot_dimension_numbers<[1], [0], [0], [1], [0, 0, 1, 1], [], []>} : vector<4x8xf32>, vector<8x256xf32>, vector<4x256xf32> -> vector<4x256xf32>
    %c0_22 = arith.constant 0 : index
    %c0_23 = arith.constant 0 : index
    %c0_24 = arith.constant 0 : index
    %18 = vector.load %arg10[%c0_22, %c0_23, %c0_24] : memref<1x4x256xf32, #tpu.memory_space<vmem>>, vector<1x4x256xf32>
    %19 = vector.shape_cast %18 : vector<1x4x256xf32> to vector<4x256xf32>
    %20 = vector.shape_cast %17 : vector<4x256xf32> to vector<1x4x256xf32>
    tpu.vector_store %arg10[%c0_22, %c0_23, %c0_24], %20 {strides = array<i32>} : memref<1x4x256xf32, #tpu.memory_space<vmem>>, vector<1x4x256xf32>,
    return
  }
  func.func @transform_0(%arg0: i32, %arg1: i32) -> (i32, i32, i32) {
    %c0_i32 = arith.constant 0 : i32
    %c0_i32_0 = arith.constant 0 : i32
    return %arg0, %c0_i32, %arg1 : i32, i32, i32
  }
  func.func @transform_1(%arg0: i32, %arg1: i32) -> (i32, i32, i32) {
    %c0_i32 = arith.constant 0 : i32
    %c0_i32_0 = arith.constant 0 : i32
    return %arg0, %c0_i32, %arg1 : i32, i32, i32
  }
  func.func @transform_2(%arg0: i32, %arg1: i32) -> (i32, i32, i32) {
    %c0_i32 = arith.constant 0 : i32
    %c0_i32_0 = arith.constant 0 : i32
    return %arg0, %c0_i32, %arg1 : i32, i32, i32
  }
  func.func @transform_3(%arg0: i32, %arg1: i32) -> (i32, i32) {
    %c0_i32 = arith.constant 0 : i32
    %c0_i32_0 = arith.constant 0 : i32
    %c0_i32_1 = arith.constant 0 : i32
    return %c0_i32, %c0_i32_0 : i32, i32
  }
  func.func @transform_4(%arg0: i32, %arg1: i32) -> (i32, i32) {
    %c0_i32 = arith.constant 0 : i32
    %c0_i32_0 = arith.constant 0 : i32
    %c0_i32_1 = arith.constant 0 : i32
    return %c0_i32, %c0_i32_0 : i32, i32
  }
  func.func @transform_5(%arg0: i32, %arg1: i32) -> (i32, i32) {
    %c0_i32 = arith.constant 0 : i32
    %c0_i32_0 = arith.constant 0 : i32
    %c0_i32_1 = arith.constant 0 : i32
    return %c0_i32, %c0_i32_0 : i32, i32
  }
  func.func @transform_6(%arg0: i32, %arg1: i32) -> (i32, i32, i32) {
    %c0_i32 = arith.constant 0 : i32
    %c0_i32_0 = arith.constant 0 : i32
    return %arg0, %c0_i32, %arg1 : i32, i32, i32
  }
  func.func @transform_7(%arg0: i32, %arg1: i32) -> (i32, i32, i32) {
    %c0_i32 = arith.constant 0 : i32
    %c0_i32_0 = arith.constant 0 : i32
    return %arg0, %c0_i32, %arg1 : i32, i32, i32
  }
  func.func @transform_8(%arg0: i32, %arg1: i32) -> (i32, i32, i32) {
    %c0_i32 = arith.constant 0 : i32
    %c0_i32_0 = arith.constant 0 : i32
    return %arg0, %c0_i32, %arg1 : i32, i32, i32
  }
}

</mosaic_0001>

<bundles_post_ra>
// kernel: tri_conv1x1_nchw.1
= control target key start
LH: loop header
LB: loop body
LE: loop exit
PB: predicated region body
PF: predicated region fallthrough
CT: control target
= control target key end

     0   :  { %s1057_s27 = smov 0   ;;  %s1059_s28 = smov 0   ;;  %s1114_s0 = inlined_call_operand.vmem [shape: f32[2,8,256], index: 0, kind: input, shape index: {}]   ;;  %s1115_s1 = inlined_call_operand.vmem [shape: f32[2,8,256], index: 1, kind: input, shape index: {}]   ;;  %s1116_s2 = inlined_call_operand.vmem [shape: f32[2,8,256], index: 2, kind: input, shape index: {}]   ;;  %s1117_s3 = inlined_call_operand.vmem [shape: f32[4,8], index: 3, kind: input, shape index: {}]   ;;  %s1118_s4 = inlined_call_operand.vmem [shape: f32[4,8], index: 4, kind: input, shape index: {}]   ;;  %s1119_s5 = inlined_call_operand.vmem [shape: f32[4,8], index: 5, kind: input, shape index: {}]   ;;  %s1120_s6 = inlined_call_operand.vmem [shape: f32[2,4,256], index: 6, kind: output, shape index: {0}]   ;;  %s1121_s7 = inlined_call_operand.vmem [shape: f32[2,4,256], index: 7, kind: output, shape index: {1}]   ;;  %s1122_s8 = inlined_call_operand.vmem [shape: f32[2,4,256], index: 8, kind: output, shape index: {2}]  }
   0x1   :  { %s1061_s29 = smov 0  }
   0x2 LB: > { %s31_s30 = sadd.s32 1, %s1005_s28  ;;  %p938_p0 = scmp.ge.s32.totalorder %s1009_s29, 1  ;;  %s1009_s29 = sphi %s1061_s29, %s19_s29   ;;  %s1005_s28 = sphi %s1059_s28, %s1124_s28   ;;  %s1001_s27 = sphi %s1057_s27, %s1123_s27  }
   0x3   : > { %p33_p1 = scmp.ge.s32.totalorder %s31_s30, 2  ;;  %p326_p2 = scmp.lt.s32.totalorder %s1009_s29, 3 }
   0x5   : > { %s1126_s30 = smov (%p33_p1, %s31_s30), 0  ;;  %p327_p3 = pnand %p938_p0, %p326_p2 }
   0x6   : > { %p405_p4 = scmp.lt.s32.totalorder (!%p327_p3), %s1001_s27, 1 }
   0x7   : > { %330 = sbr.rel (%p327_p3) target bundleno = 220 (0xdc), region = 44 }
   0xc   : > { %v1011_v0 = vmov 0.0   ;;  %s1128_s27 = smov (!%p405_p4, %s1001_s27), 1  ;;  %v464_v1 = vld [vmem:[%s1117_s3] sm:$0xf]  ;;  %vm467_vm0 = vcmask 64512  }
   0xd   : > { %535 = vmatprep.mubr.f32.mxu0 %v1011_v0  ;;  %617 = vmatprep.mubr.f32.mxu1 %v1011_v0  ;;  %s956_s9 = sshll.u32 %s1128_s27, 4  ;;  %v547_v8 = vld [vmem:[%s1118_s4] sm:$0xf]  ;;  %s959_s25 = sshll.u32 %s1128_s27, 3 }
   0xe   : > { %s412_s12 = scalar_lea.vmem %s1114_s0, %s956_s9  ;;  %s432_s17 = scalar_lea.vmem %s1116_s2, %s956_s9  ;;  %v629_v9 = vld [vmem:[%s1119_s5] sm:$0xf] }
   0xf   : > { %v466_v2 = vld [vmem:[%s412_s12 + $0x8] sm:$0xff]  ;;  %v465_v3 = vld [vmem:[%s412_s12] sm:$0xff]  ;;  %s422_s20 = scalar_lea.vmem %s1115_s1, %s956_s9  ;;  %s442_s10 = scalar_lea.vmem %s1120_s6, %s959_s25 }
  0x10   : > { %v631_v4 = vld [vmem:[%s432_s17 + $0x8] sm:$0xff]  ;;  %501 = vmatprep.subr.mxu0 %v466_v2  ;;  %v630_v6 = vld [vmem:[%s432_s17] sm:$0xff]  ;;  %s452_s13 = scalar_lea.vmem %s1121_s7, %s959_s25  ;;  %s462_s27 = scalar_lea.vmem %s1122_s8, %s959_s25 }
  0x11   : > { %v549_v5 = vld [vmem:[%s422_s20 + $0x8] sm:$0xff]  ;;  %v548_v7 = vld [vmem:[%s422_s20] sm:$0xff]  ;;  %502 = vmatpush1.msra.mxu0 %v465_v3 }
  0x12   : > { %583 = vmatprep.subr.mxu1 %v549_v5  ;;  %951 = vmatmul.mubr.msk.f32.vlgmr.msra.gmra.mxu0 %vm467_vm0, %v464_v1 }
  0x13   : > { %665 = vmatprep.subr.mxu0 %v631_v4  ;;  %584 = vmatpush1.msra.mxu1 %v548_v7 }
  0x14   : > { %666 = vmatpush1.msra.mxu0 %v630_v6  ;;  %952 = vmatmul.mubr.msk.f32.vlgmr.msra.gmra.mxu1 %vm467_vm0, %v547_v8 }
  0x15   : > { %699 = vmatprep.mubr.f32.mxu0 %v1011_v0 }
  0x16   : > { %953 = vmatmul.mubr.msk.f32.vlgmr.msra.gmra.mxu0 %vm467_vm0, %v629_v9 }
  0xd2   : > { %v537_v10 = vpop.f32.mrf.mxu0 }
  0xd4   : > { %v539_v11 = vpop.f32.mrf.mxu0  ;;  %v619_v12 = vpop.f32.mrf.mxu1 }
  0xd5   : > { %v544_v13 = vcombine.low %v537_v10, %v539_v11 }
  0xd6   : > { %v701_v14 = vpop.f32.mrf.mxu0  ;;  %v621_v15 = vpop.f32.mrf.mxu1 }
  0xd7   : > { %546 = vst [vmem:[%s442_s10] sm:$0xff] %v544_v13  ;;  %v626_v16 = vcombine.low %v619_v12, %v621_v15 }
  0xd8   : > { %v703_v17 = vpop.f32.mrf.mxu0 }
  0xd9   : > { %628 = vst [vmem:[%s452_s13] sm:$0xff] %v626_v16  ;;  %v708_v18 = vcombine.low %v701_v14, %v703_v17 }
  0xdb   : > { %710 = vst [vmem:[%s462_s27] sm:$0xff] %v708_v18 }
  0xdc PF: > { %s19_s29 = sadd.s32 1, %s1009_s29   ;;  %s1123_s27 = smov %s1005_s28 }
  0xdd   : > { %p16_p5 = scmp.ge.s32.totalorder %s19_s29, 4   ;;  %s1124_s28 = smov %s1126_s30 }
  0xdf   :  { %18 = sbr.rel (!%p16_p5) target bundleno = 2 (0x2), region = 104 }

</bundles_post_ra>
